<compile_context>
chip_gen: v6e
topology: v6e:2x2x1
jax: 0.10.0
libtpu: 0.0.40
codegen_flags: <defaults>
</compile_context>

<pallas_src>
import math

import jax
import jax.numpy as jnp
from jax.experimental import pallas as pl
from jax.experimental.pallas import tpu as pltpu


def _layer_scale_kernel(x_ref, gamma_ref, o_ref):
    # x_ref: (block_rows, block_d) tile, gamma_ref: (1, block_d) tile (broadcasts over rows)
    o_ref[...] = (x_ref[...] * gamma_ref[...]).astype(o_ref.dtype)


def _sublane_multiple(itemsize):
    # (8, 128) f32 tile, packed along sublanes for narrower dtypes (16 bf16 / 32 int8).
    return max(8, 32 // max(1, itemsize))


def _device_vmem_bytes():
    """Physical VMEM per TensorCore; conservative 64 MiB fallback if the query fails."""
    try:
        info = pltpu.get_tpu_info()
        vmem = getattr(info, "vmem_capacity_bytes", None)
        if vmem:
            return int(vmem)
    except Exception:
        pass
    return 64 * 1024 * 1024


def _pick_block_d(d_eff):
    """Tile D only when it is very large, keeping per-tile VMEM bounded."""
    if d_eff <= 4096 or d_eff % 128 != 0:
        return d_eff
    bd = 4096
    while bd >= 128 and d_eff % bd != 0:
        bd -= 128
    return max(bd, 128)


def _pick_block_rows(rows, block_d, itemsize, target_tile_bytes, min_row_blocks=2):
    """Largest sublane-aligned row tile under the VMEM budget, with >=2 row blocks when
    possible so the parallel row axis can be sharded across both v7x TensorCores."""
    sub = _sublane_multiple(itemsize)
    max_rows = max(sub, target_tile_bytes // max(1, block_d * itemsize))
    if rows >= min_row_blocks * sub:
        max_rows = min(max_rows, max(sub, rows // min_row_blocks))
    if rows <= max_rows:
        return rows  # single tile covers all rows (block == full dim is always legal)
    br = max(sub, (max_rows // sub) * sub)
    # Prefer a tile that evenly divides rows (no partial last block), but don't shrink
    # below half the budgeted tile just to achieve divisibility — masking is cheap.
    if rows % sub == 0:
        cand = br
        while cand >= max(sub, br // 2):
            if rows % cand == 0:
                return cand
            cand -= sub
    return br  # non-divisible: Pallas masks the partial last block


def layer_scale(x, gamma, *, block_rows=None, donate_x=False,
                force_pallas=False, small_bytes_threshold=256 * 1024):
    """LayerScale forward: x * gamma. x: (..., D); gamma: (D,)."""
    orig_shape = x.shape
    D = orig_shape[-1]
    assert gamma.shape == (D,), f"gamma must be ({D},), got {gamma.shape}"

    itemsize = jnp.dtype(x.dtype).itemsize
    # Keep the multiply in x's dtype for >=16-bit floats; otherwise keep gamma in f32 so
    # tiny init values (1e-5) don't underflow in fp8/int dtypes.
    if jnp.issubdtype(x.dtype, jnp.floating) and itemsize >= 2:
        gamma = gamma.astype(x.dtype)
    else:
        gamma = gamma.astype(jnp.float32)

    # Small-tensor fast path: pallas_call fixed overhead dominates; plain XLA is faster
    # and fusible with neighbors.
    if not force_pallas and x.size * itemsize < small_bytes_threshold:
        return (x * gamma).astype(x.dtype)

    x2 = x.reshape(-1, D)  # (rows, D)
    rows, d_eff = x2.shape
    gamma2 = gamma

    # Lane-dense folding: when D is not a multiple of 128, pack `fold` consecutive rows
    # into the lane axis (fold = lcm(D,128)//D == 128//gcd(D,128)) so stores are full-lane
    # vst instead of masked vst.msk partial stores. Falls back when rows % fold != 0.
    if d_eff % 128 != 0:
        fold = 128 // math.gcd(d_eff, 128)
        if fold > 1 and rows % fold == 0:
            x2 = x2.reshape(rows // fold, d_eff * fold)
            gamma2 = jnp.tile(gamma, fold)
            rows, d_eff = x2.shape
    gamma2 = gamma2.reshape(1, d_eff)

    # Generation-aware budgets.
    device_vmem = _device_vmem_bytes()
    vmem_cap = max(16 << 20, min(int(0.75 * device_vmem), 96 << 20))
    target_tile_bytes = (8 << 20) if device_vmem >= (96 << 20) else (4 << 20)

    block_d = _pick_block_d(d_eff)
    sub = _sublane_multiple(itemsize)
    if block_rows is None:
        block_rows = _pick_block_rows(rows, block_d, itemsize, target_tile_bytes)
    else:
        block_rows = max(1, min(block_rows, rows))
        if block_rows != rows and block_rows % sub != 0:
            block_rows = max(sub, (block_rows // sub) * sub)
    # Never let a tile exceed what physical VMEM can comfortably double-buffer.
    max_tile_rows = max(sub, (vmem_cap // 6) // max(1, block_d * itemsize))
    if block_rows > max_tile_rows:
        block_rows = max(sub, (max_tile_rows // sub) * sub)

    grid = (pl.cdiv(rows, block_rows), pl.cdiv(d_eff, block_d))

    # VMEM budget: double-buffered x + out tiles, gamma tiles, plus headroom; gen-capped.
    tile_bytes = block_rows * block_d * itemsize
    vmem_limit = int(min(
        vmem_cap,
        max(8 << 20, 5 * tile_bytes + 4 * block_d * itemsize + (1 << 20)),
    ))

    n_elems = rows * d_eff
    cost = pl.CostEstimate(
        flops=n_elems,
        transcendentals=0,
        bytes_accessed=2 * n_elems * itemsize + d_eff * itemsize,
    )

    out = pl.pallas_call(
        _layer_scale_kernel,
        out_shape=jax.ShapeDtypeStruct((rows, d_eff), x.dtype),
        grid_spec=pltpu.PrefetchScalarGridSpec(
            num_scalar_prefetch=0,
            grid=grid,
            in_specs=[
                pl.BlockSpec((block_rows, block_d), lambda i, j: (i, j)),
                pl.BlockSpec((1, block_d), lambda i, j: (0, j)),
            ],
            out_specs=pl.BlockSpec((block_rows, block_d), lambda i, j: (i, j)),
        ),
        compiler_params=pltpu.CompilerParams(
            dimension_semantics=("parallel", "parallel"),
            vmem_limit_bytes=vmem_limit,
        ),
        cost_estimate=cost,
        input_output_aliases=({0: 0} if donate_x else {}),
    )(x2, gamma2)
    return out.reshape(orig_shape)


if __name__ == "__main__":
    # Module init: gamma = init_values * ones(dim)   (deterministic, as in __init__)
    B, N, D = 2, 8, 32
    init_values = 1e-5
    gamma = init_values * jnp.ones((D,), dtype=jnp.float32)

    key = jax.random.PRNGKey(0)
    x = jax.random.normal(key, (B, N, D), dtype=jnp.float32)

    # force_pallas=True so the Pallas path (not the tiny-tensor XLA fast path) is exercised.
    y = layer_scale(x, gamma, force_pallas=True)
    jax.block_until_ready(y)

    # correctness check against plain JAX reference
    y_ref = x * gamma
    assert y.shape == x.shape and y.dtype == x.dtype
    assert jnp.allclose(y, y_ref, atol=1e-6, rtol=1e-6), "mismatch vs reference"

    print("KERNEL_OK")
</pallas_src>

<mosaic_0001>
module attributes {stable_mosaic.version = 11 : i64} {
  func.func @_layer_scale_kernel(%arg0: i32, %arg1: i32, %arg2: memref<4x128xf32, #tpu.memory_space<vmem>>, %arg3: memref<1x128xf32, #tpu.memory_space<vmem>>, %arg4: memref<4x128xf32, #tpu.memory_space<vmem>>) attributes {dimension_semantics = [#tpu.dimension_semantics<parallel>, #tpu.dimension_semantics<parallel>], iteration_bounds = array<i64: 1, 1>, scalar_prefetch = 0 : i64, scratch_operands = 0 : i64, tpu.core_type = #tpu.core_type<tc>, window_params = [{transform_indices = @transform_0, window_bounds = array<i64: 4, 128>}, {transform_indices = @transform_1, window_bounds = array<i64: 1, 128>}, {transform_indices = @transform_2, window_bounds = array<i64: 4, 128>}]} {
    %c0 = arith.constant 0 : index
    %c0_0 = arith.constant 0 : index
    %0 = vector.load %arg2[%c0, %c0_0] : memref<4x128xf32, #tpu.memory_space<vmem>>, vector<4x128xf32>
    %c0_1 = arith.constant 0 : index
    %c0_2 = arith.constant 0 : index
    %1 = vector.load %arg3[%c0_1, %c0_2] : memref<1x128xf32, #tpu.memory_space<vmem>>, vector<1x128xf32>
    %2 = vector.broadcast %1 : vector<1x128xf32> to vector<4x128xf32>
    %3 = arith.mulf %0, %2 : vector<4x128xf32>
    %c0_3 = arith.constant 0 : index
    %c0_4 = arith.constant 0 : index
    %4 = vector.load %arg4[%c0_3, %c0_4] : memref<4x128xf32, #tpu.memory_space<vmem>>, vector<4x128xf32>
    tpu.vector_store %arg4[%c0_3, %c0_4], %3 {strides = array<i32>} : memref<4x128xf32, #tpu.memory_space<vmem>>, vector<4x128xf32>,
    return
  }
  func.func @transform_0(%arg0: i32, %arg1: i32) -> (i32, i32) {
    %c0_i32 = arith.constant 0 : i32
    return %arg0, %arg1 : i32, i32
  }
  func.func @transform_1(%arg0: i32, %arg1: i32) -> (i32, i32) {
    %c0_i32 = arith.constant 0 : i32
    %c0_i32_0 = arith.constant 0 : i32
    return %c0_i32, %arg1 : i32, i32
  }
  func.func @transform_2(%arg0: i32, %arg1: i32) -> (i32, i32) {
    %c0_i32 = arith.constant 0 : i32
    return %arg0, %arg1 : i32, i32
  }
}

</mosaic_0001>

<bundles_post_ra>
// kernel: tpu_custom_call.1
= control target key start
LH: loop header
LB: loop body
LE: loop exit
PB: predicated region body
PF: predicated region fallthrough
CT: control target
= control target key end

     0   :  { %7 = vsyncpa [#allocation3], 0  ;;  %s122_s0 = inlined_call_operand.hbm [shape: f32[4,128], index: 0, kind: input, shape index: {}]   ;;  %s123_s1 = inlined_call_operand.vmem [shape: f32[1,128], index: 1, kind: input, shape index: {}]   ;;  %s124_s2 = inlined_call_operand.hbm [shape: f32[4,128], index: 2, kind: output, shape index: {}]  }
   0x1   :  { %8 = vsyncpa [#allocation4], 0  ;;  %s96_s9 = smov [#allocation2]  }
   0x2   :  { %s15_s10 = sshll.u32 %s96_s9, 4  ;;  %s16_s10 = int_to_ptr.vmem [resolvable:$true] %s15_s10 }
   0x3   :  { %s60_s11 = scalar_lea.vmem %s16_s10, 64  ;;  %p65_p1 = scmp.lt.s32.totalorder %s16_s10, %s16_s10 }
   0x4   :  { %p61_p0 = scmp.ne.s32.totalorder %s16_s10, %s60_s11  ;;  %p66_p2 = scmp.lt.s32.totalorder %s60_s11, %s60_s11 }
   0x6   :  { %p67_p3 = por %p66_p2, %p65_p1 }
   0x8   :  { %p68_p4 = pnand %p67_p3, %p61_p0 }
   0xa   :  { %71 = shalt.err (!%p68_p4)
}
   0xb   :  { %18 = dma.hbm_to_vmem [thread:$0]  %s122_s0, 64, %s16_s10, [#allocation3]  }
   0xc   :  { %92 = dma.done.wait [#allocation3], 64  }
   0xd   :  { %93 = vsyncadd [#allocation3], 4294967232  ;;  %s97_s14 = smov [#allocation5]   ;;  %v24_v0 = vld [vmem:[#allocation2] sm:$0xf] }
   0xe   :  { %s40_s15 = sshll.u32 %s97_s14, 4  ;;  %v49_v1 = vld [vmem:[%s123_s1] ss:$0 sm:$0xff]  ;;  %s41_s15 = int_to_ptr.vmem [resolvable:$true] %s40_s15 }
   0xf   :  { %v32_v2 = vmul.f32 %v49_v1, %v24_v0  ;;  %s72_s18 = scalar_lea.vmem %s41_s15, 64  ;;  %p77_p6 = scmp.lt.s32.totalorder %s41_s15, %s41_s15 }
  0x10   :  { %p73_p5 = scmp.ne.s32.totalorder %s41_s15, %s72_s18  ;;  %p78_p7 = scmp.lt.s32.totalorder %s72_s18, %s72_s18 }
  0x11   :  { %33 = vst [vmem:[#allocation5] sm:$0xf] %v32_v2 }
  0x12   :  { %p79_p8 = por %p78_p7, %p77_p6 }
  0x14   :  { %p80_p9 = pnand %p79_p8, %p73_p5 }
  0x16   :  { %83 = shalt.err (!%p80_p9)
}
  0x17   :  { %43 = dma.vmem_to_hbm [thread:$0]  %s41_s15, 64, %s124_s2, [#allocation4]  }
  0x18   :  { %94 = dma.done.wait [#allocation4], 64  }
  0x19   :  { %95 = vsyncadd [#allocation4], 4294967232 }
  0x1a   :  { %47 = vsyncpa [#allocation3], 1 }
  0x1b   :  { %48 = vsyncpa [#allocation4], 1 }

</bundles_post_ra>
